<compile_context>
chip_gen: v7x
topology: tpu7x:2x2x1
jax: 0.10.0
libtpu: 0.0.40
codegen_flags: <defaults>
</compile_context>

<pallas_src>
import functools

import jax
import jax.numpy as jnp
from jax.experimental import pallas as pl
from jax.experimental.pallas import tpu as pltpu


def _round_up(x, m):
    return (x + m - 1) // m * m


def snapt_ac_kernel(x_ref, w1_ref, w2_ref, out_ref, *, num_actions):
    # x_ref  : (block_b, num_inputs + 1)  -- last column is constant 1 (bias fold)
    # w1_ref : (num_inputs + 1, 2H + 1)   -- [wc1 | wa1 | 0] ; bias row [bc1|ba1|1]
    # w2_ref : (2H + 1, A + 1)            -- rows: [0|wc2], [wa2|0], bias row [ba2|bc2]
    # out_ref: (block_b, A + 1)           -- [policy | value]
    h = jnp.dot(x_ref[...], w1_ref[...], preferred_element_type=jnp.float32)
    h = jnp.maximum(h, 0.0)  # relu(1) = 1 keeps the folded-bias column alive
    z = jnp.dot(h, w2_ref[...], preferred_element_type=jnp.float32)

    logits = z[:, :num_actions]
    value = z[:, num_actions:]

    # numerically-stable softmax over the action dimension (exact normalization)
    m = jnp.max(logits, axis=-1, keepdims=True)
    e = jnp.exp(logits - m)
    denom = jnp.sum(e, axis=-1, keepdims=True)
    policy = e / denom

    out_ref[...] = jnp.concatenate([policy, value], axis=-1)


def snapt_ac_forward(x, fused):
    """x: (B, num_inputs) float32. fused: dict with fused weights 'w1', 'w2'."""
    w1, w2 = fused["w1"], fused["w2"]
    B, num_inputs = x.shape
    A = w2.shape[1] - 1

    # Batch tile: >=256 rows for large batches (fills one MXU pass per step),
    # otherwise the smallest sublane-aligned tile.
    block_b = 256 if B >= 256 else _round_up(max(B, 8), 8)
    B_pad = _round_up(B, block_b)

    ones = jnp.ones((B, 1), jnp.float32)
    x_aug = jnp.concatenate([x.astype(jnp.float32), ones], axis=-1)
    if B_pad != B:
        x_aug = jnp.pad(x_aug, ((0, B_pad - B), (0, 0)))

    kernel = functools.partial(snapt_ac_kernel, num_actions=A)
    out = pl.pallas_call(
        kernel,
        out_shape=jax.ShapeDtypeStruct((B_pad, A + 1), jnp.float32),
        grid=(B_pad // block_b,),
        in_specs=[
            pl.BlockSpec((block_b, num_inputs + 1), lambda i: (i, 0)),
            pl.BlockSpec(w1.shape, lambda i: (0, 0)),   # weights VMEM-resident
            pl.BlockSpec(w2.shape, lambda i: (0, 0)),
        ],
        out_specs=pl.BlockSpec((block_b, A + 1), lambda i: (i, 0)),
        compiler_params=pltpu.CompilerParams(dimension_semantics=("parallel",)),
    )(x_aug, w1, w2)

    policy = out[:B, :A]
    value = out[:B, A:]
    return policy, value


snapt_ac_forward = jax.jit(snapt_ac_forward)


def fuse_params(p):
    """Build the fused, bias-folded weights from per-layer params (done once)."""
    num_inputs, H = p["wc1"].shape
    A = p["wa2"].shape[1]
    # layer 1: (num_inputs + 1, 2H + 1); columns = [critic hidden | actor hidden | const-1]
    top = jnp.concatenate(
        [p["wc1"], p["wa1"], jnp.zeros((num_inputs, 1), jnp.float32)], axis=1)
    bias_row = jnp.concatenate(
        [p["bc1"], p["ba1"], jnp.ones((1, 1), jnp.float32)], axis=1)
    w1 = jnp.concatenate([top, bias_row], axis=0)
    # layer 2: (2H + 1, A + 1); columns = [policy logits | value]
    critic_rows = jnp.concatenate([jnp.zeros((H, A), jnp.float32), p["wc2"]], axis=1)
    actor_rows = jnp.concatenate([p["wa2"], jnp.zeros((H, 1), jnp.float32)], axis=1)
    bias2_row = jnp.concatenate([p["ba2"], p["bc2"]], axis=1)
    w2 = jnp.concatenate([critic_rows, actor_rows, bias2_row], axis=0)
    return {"w1": w1, "w2": w2}


def init_params(key, num_inputs, num_actions, hidden_size):
    """nn.Linear-style init U(-1/sqrt(fan_in), 1/sqrt(fan_in)); weights stored (in, out)."""
    def linear(k, fan_in, fan_out):
        kw, kb = jax.random.split(k)
        bound = 1.0 / jnp.sqrt(jnp.float32(fan_in))
        w = jax.random.uniform(kw, (fan_in, fan_out), jnp.float32, -bound, bound)
        b = jax.random.uniform(kb, (1, fan_out), jnp.float32, -bound, bound)
        return w, b

    k1, k2, k3, k4 = jax.random.split(key, 4)
    wc1, bc1 = linear(k1, num_inputs, hidden_size)
    wc2, bc2 = linear(k2, hidden_size, 1)
    wa1, ba1 = linear(k3, num_inputs, hidden_size)
    wa2, ba2 = linear(k4, num_inputs if False else hidden_size, num_actions)
    return dict(wc1=wc1, bc1=bc1, wc2=wc2, bc2=bc2,
                wa1=wa1, ba1=ba1, wa2=wa2, ba2=ba2)


if __name__ == "__main__":
    num_inputs, num_actions, hidden_size = 16, 8, 32
    batch = 4  # small rollout of states; the wrapper also handles B=1

    key = jax.random.PRNGKey(0)
    k_params, k_x = jax.random.split(key)
    params = init_params(k_params, num_inputs, num_actions, hidden_size)
    fused = fuse_params(params)
    x = jax.random.normal(k_x, (batch, num_inputs), jnp.float32)

    policy, value = snapt_ac_forward(x, fused)
    jax.block_until_ready((policy, value))

    # sanity check against a plain-JAX reference using the unfused params
    def ref(x, p):
        v = jnp.maximum(x @ p["wc1"] + p["bc1"], 0.0) @ p["wc2"] + p["bc2"]
        a = jnp.maximum(x @ p["wa1"] + p["ba1"], 0.0) @ p["wa2"] + p["ba2"]
        return jax.nn.softmax(a, axis=-1), v

    ref_policy, ref_value = ref(x, params)
    assert policy.shape == (batch, num_actions) and value.shape == (batch, 1)
    assert jnp.allclose(policy, ref_policy, atol=1e-4), "policy mismatch"
    assert jnp.allclose(value, ref_value, atol=1e-4, rtol=1e-4), "value mismatch"
    assert jnp.allclose(jnp.sum(policy, axis=-1), 1.0, atol=1e-4), "softmax not normalized"

    # single-state path (matches PyTorch forward's unsqueeze(0) semantics)
    p1, v1 = snapt_ac_forward(x[:1], fused)
    jax.block_until_ready((p1, v1))
    assert jnp.allclose(p1, ref_policy[:1], atol=1e-4), "single-state policy mismatch"
    assert jnp.allclose(v1, ref_value[:1], atol=1e-4, rtol=1e-4), "single-state value mismatch"

    print("KERNEL_OK")
</pallas_src>

<mosaic_0001>
module attributes {stable_mosaic.version = 11 : i64} {
  func.func @snapt_ac_kernel(%arg0: i32, %arg1: memref<8x17xf32, #tpu.memory_space<vmem>>, %arg2: memref<17x65xf32, #tpu.memory_space<vmem>>, %arg3: memref<65x9xf32, #tpu.memory_space<vmem>>, %arg4: memref<8x9xf32, #tpu.memory_space<vmem>>) attributes {dimension_semantics = [#tpu.dimension_semantics<parallel>], iteration_bounds = array<i64: 1>, scalar_prefetch = 0 : i64, scratch_operands = 0 : i64, tpu.core_type = #tpu.core_type<tc>, window_params = [{transform_indices = @transform_0, window_bounds = array<i64: 8, 17>}, {pipeline_mode = #tpu.pipeline_mode<synchronous>, transform_indices = @transform_1, window_bounds = array<i64: 17, 65>}, {pipeline_mode = #tpu.pipeline_mode<synchronous>, transform_indices = @transform_2, window_bounds = array<i64: 65, 9>}, {transform_indices = @transform_3, window_bounds = array<i64: 8, 9>}]} {
    %c0 = arith.constant 0 : index
    %c0_0 = arith.constant 0 : index
    %0 = vector.load %arg1[%c0, %c0_0] : memref<8x17xf32, #tpu.memory_space<vmem>>, vector<8x17xf32>
    %c0_1 = arith.constant 0 : index
    %c0_2 = arith.constant 0 : index
    %1 = vector.load %arg2[%c0_1, %c0_2] : memref<17x65xf32, #tpu.memory_space<vmem>>, vector<17x65xf32>
    %cst = arith.constant dense<0.000000e+00> : vector<8x65xf32>
    %2 = tpu.matmul %0, %1, %cst {dimension_numbers = #tpu.dot_dimension_numbers<[1], [0], [0], [1], [0, 0, 1, 1], [], []>} : vector<8x17xf32>, vector<17x65xf32>, vector<8x65xf32> -> vector<8x65xf32>
    %cst_3 = arith.constant 0.000000e+00 : f32
    %3 = vector.broadcast %cst_3 : f32 to vector<8x65xf32>
    %4 = arith.maximumf %2, %3 : vector<8x65xf32>
    %c0_4 = arith.constant 0 : index
    %c0_5 = arith.constant 0 : index
    %5 = vector.load %arg3[%c0_4, %c0_5] : memref<65x9xf32, #tpu.memory_space<vmem>>, vector<65x9xf32>
    %cst_6 = arith.constant dense<0.000000e+00> : vector<8x9xf32>
    %6 = tpu.matmul %4, %5, %cst_6 {dimension_numbers = #tpu.dot_dimension_numbers<[1], [0], [0], [1], [0, 0, 1, 1], [], []>} : vector<8x65xf32>, vector<65x9xf32>, vector<8x9xf32> -> vector<8x9xf32>
    %7 = vector.extract_strided_slice %6 {offsets = [0, 0], sizes = [8, 8], strides = [1, 1]} : vector<8x9xf32> to vector<8x8xf32>
    %8 = vector.extract_strided_slice %6 {offsets = [0, 8], sizes = [8, 1], strides = [1, 1]} : vector<8x9xf32> to vector<8x1xf32>
    %cst_7 = arith.constant dense<0xFF800000> : vector<8xf32>
    %9 = vector.multi_reduction <maximumf>, %7, %cst_7 [1] : vector<8x8xf32> to vector<8xf32>
    %10 = vector.shape_cast %9 : vector<8xf32> to vector<8x1xf32>
    %11 = vector.broadcast %10 : vector<8x1xf32> to vector<8x8xf32>
    %12 = arith.subf %7, %11 : vector<8x8xf32>
    %13 = math.exp %12 : vector<8x8xf32>
    %cst_8 = arith.constant dense<0.000000e+00> : vector<8xf32>
    %14 = vector.multi_reduction <add>, %13, %cst_8 [1] : vector<8x8xf32> to vector<8xf32>
    %15 = vector.shape_cast %14 : vector<8xf32> to vector<8x1xf32>
    %16 = vector.broadcast %15 : vector<8x1xf32> to vector<8x8xf32>
    %17 = arith.divf %13, %16 : vector<8x8xf32>
    %18 = tpu.concatenate %17, %8 in 1 : vector<8x8xf32>, vector<8x1xf32> -> vector<8x9xf32>
    %c0_9 = arith.constant 0 : index
    %c0_10 = arith.constant 0 : index
    %19 = vector.load %arg4[%c0_9, %c0_10] : memref<8x9xf32, #tpu.memory_space<vmem>>, vector<8x9xf32>
    tpu.vector_store %arg4[%c0_9, %c0_10], %18 {strides = array<i32>} : memref<8x9xf32, #tpu.memory_space<vmem>>, vector<8x9xf32>,
    return
  }
  func.func @transform_0(%arg0: i32) -> (i32, i32) {
    %c0_i32 = arith.constant 0 : i32
    %c0_i32_0 = arith.constant 0 : i32
    return %arg0, %c0_i32 : i32, i32
  }
  func.func @transform_1(%arg0: i32) -> (i32, i32) {
    %c0_i32 = arith.constant 0 : i32
    %c0_i32_0 = arith.constant 0 : i32
    %c0_i32_1 = arith.constant 0 : i32
    return %c0_i32, %c0_i32_0 : i32, i32
  }
  func.func @transform_2(%arg0: i32) -> (i32, i32) {
    %c0_i32 = arith.constant 0 : i32
    %c0_i32_0 = arith.constant 0 : i32
    %c0_i32_1 = arith.constant 0 : i32
    return %c0_i32, %c0_i32_0 : i32, i32
  }
  func.func @transform_3(%arg0: i32) -> (i32, i32) {
    %c0_i32 = arith.constant 0 : i32
    %c0_i32_0 = arith.constant 0 : i32
    return %arg0, %c0_i32 : i32, i32
  }
}

</mosaic_0001>

<bundles_post_ra>
// kernel: snapt_ac_forward.1
= control target key start
LH: loop header
LB: loop body
LE: loop exit
PB: predicated region body
PF: predicated region fallthrough
CT: control target
= control target key end

     0   :  { %v272_v0 = vmov 0.0|0.0   ;;  %vm273_vm0 = vmmov 0   ;;  %v274_v3 = vmov 0.0   ;;  %vm22_vm1 = vcmask 1040384   ;;  %s342_s1 = inlined_call_operand.vmem [shape: f32[17,65], index: 1, kind: input, shape index: {}]   ;;  %s343_s2 = inlined_call_operand.vmem [shape: f32[65,9], index: 2, kind: input, shape index: {}]   ;;  %s344_s0 = inlined_call_operand.vmem [shape: f32[8,17], index: 0, kind: input, shape index: {}]   ;;  %s345_s3 = inlined_call_operand.vmem [shape: f32[8,9], index: 3, kind: output, shape index: {}]  }
   0x1   :  { %250 = vmatprep.subr.bf16.mxu0 %v272_v0  ;;  %v15_v1 = vld [vmem:[%s342_s1] sm:$0xff]  ;;  %v16_v2 = vld [vmem:[%s342_s1 + $0x8] sm:$0xff]  ;;  %226 = vmatprep.mubr.msk.f32.mxu0 %vm273_vm0, %v274_v3  ;;  %v99_v8 = vld [vmem:[%s343_s2 + $0x10] sm:$0xff]  ;;  %vm18_vm2 = vcmask 138240   ;;  %vm106_vm3 = vcmask 531456   ;;  %vm183_vm4 = vcmask 64512  }
   0x2   :  { %v251_v4 = vpack.c.bf16 %v16_v2, %v15_v1  ;;  %253 = vmatprep.subr.bf16.mxu1 %v272_v0  ;;  %v97_v5 = vld [vmem:[%s343_s2] sm:$0xff]  ;;  %v98_v6 = vld [vmem:[%s343_s2 + $0x8] sm:$0xff]  ;;  %247 = vmatprep.mubr.msk.f32.mxu1 %vm273_vm0, %v274_v3  ;;  %v100_v9 = vld [vmem:[%s343_s2 + $0x18] sm:$0xff]  ;;  %vm196_vm5 = vcmask 72704  }
   0x3   :  { %v254_v7 = vpack.c.bf16 %v98_v6, %v97_v5  ;;  %v17_v10 = vld [vmem:[%s342_s1 + $0x10] sm:$0x1]  ;;  %v257_v11 = vpack.c.bf16 %v100_v9, %v99_v8  ;;  %v14_v12 = vld [vmem:[%s344_s0] sm:$0xff]  ;;  %v102_v14 = vld [vmem:[%s343_s2 + $0x28] sm:$0xff] }
   0x4   :  { %252 = vmatpush3.bf16.msra.mxu0 %v251_v4  ;;  %v101_v13 = vld [vmem:[%s343_s2 + $0x20] sm:$0xff]  ;;  %v103_v16 = vld [vmem:[%s343_s2 + $0x30] sm:$0xff]  ;;  %v104_v17 = vld [vmem:[%s343_s2 + $0x38] sm:$0xff] }
   0x5   :  { %224 = vmatprep.subr.mxu0 %v274_v3  ;;  %255 = vmatpush3.bf16.msra.mxu1 %v254_v7  ;;  %v260_v15 = vpack.c.bf16 %v102_v14, %v101_v13  ;;  %v263_v18 = vpack.c.bf16 %v104_v17, %v103_v16  ;;  %v105_v19 = vld [vmem:[%s343_s2 + $0x40] sm:$0x1] }
   0x6   :  { %256 = vmatprep.subr.bf16.mxu1 %v272_v0 }
   0x8   :  { %225 = vmatpush3.msk.msra.mxu0 %vm22_vm1, %v17_v10 }
   0x9   :  { %227 = vmatmul.mubr.msk.f32.vlgmr.msra.gmra.mrb[0].mxu0 %vm18_vm2, %v14_v12  ;;  %258 = vmatpush3.bf16.msra.mxu1 %v257_v11 }
   0xa   :  { %259 = vmatprep.subr.bf16.mxu1 %v272_v0 }
   0xd   :  { %261 = vmatpush3.bf16.msra.mxu1 %v260_v15 }
   0xe   :  { %262 = vmatprep.subr.bf16.mxu1 %v272_v0 }
  0x11   :  { %264 = vmatpush3.bf16.msra.mxu1 %v263_v18 }
  0x12   :  { %245 = vmatprep.subr.mxu1 %v274_v3 }
  0x15   :  { %246 = vmatpush3.msk.msra.mxu1 %vm22_vm1, %v105_v19 }
  0xdc   :  { %v92_v20 = vpop.f32.mrb[0].mxu0 }
  0xdd   :  { %v96_v21 = vmax.f32 %v92_v20, 0.0  ;;  %v228_v22 = vpop.f32.mrb[1].mxu0 }
  0xdf   :  { %248 = vmatmul.mubr.msk.f32.vlgmr.msra.gmra.mrb[0].mxu1 %vm106_vm3, %v96_v21 }
 0x1b2   :  { %v179_v23 = vpop.f32.mrb[0].mxu1 }
 0x1b3   :  { %v249_v24 = vpop.f32.mrb[1].mxu1  ;;  %v184_v25 = vsel %vm183_vm4, %v179_v23, -inf }
 0x1b4   :  { %185 = vmax.xlane.f32.xlu0 %v184_v25 }
 0x241   :  { %v186_v26 = vpop.xlane.xlu0 %185 }
 0x242   :  { %v187_v27 = vsub.f32 %v179_v23, %v186_v26 }
 0x244   :  { %v188_v28 = vmul.f32 1.442695, %v187_v27 }
 0x246   :  { %268 = vpow2.f32 %v188_v28 }
 0x250   :  { %v269_v29 = vpop.eup %268 }
 0x251   :  { %v190_v30 = vsel %vm183_vm4, %v269_v29, 0.0 }
 0x252   :  { %191 = vadd.xlane.f32.xlu0 %v190_v30 }
 0x2df   :  { %v192_v31 = vpop.xlane.xlu0 %191 }
 0x2e0   :  { %270 = vrcp.f32 %v192_v31 }
 0x2ea   :  { %v271_v32 = vpop.eup %270 }
 0x2eb   :  { %v194_v33 = vmul.f32 %v271_v32, %v269_v29 }
 0x2ed   :  { %v195_v34 = vsel %vm183_vm4, %v194_v33, %v179_v23 }
 0x2ee   :  { %197 = vst.msk [vmem:[%s345_s3] sm:$0xff] %vm196_vm5, %v195_v34 }

</bundles_post_ra>
